<compile_context>
chip_gen: v7x
topology: tpu7x:2x2x1
jax: 0.10.0
libtpu: 0.0.40
codegen_flags: <defaults>
</compile_context>

<pallas_src>
import functools
import math

import jax
import jax.numpy as jnp
from jax.experimental import pallas as pl
from jax.experimental.pallas import tpu as pltpu


def _round_up(x, m):
    return ((x + m - 1) // m) * m


def _round_down(x, m):
    return (x // m) * m


def _cdiv(a, b):
    return -(-a // b)


_SUBLANE = {1: 32, 2: 16, 4: 8}


def _padded_block_bytes(shape, dtype):
    """Bytes a 2-D VMEM block physically occupies ((sublane,128)-tile padded)."""
    itemsize = jnp.dtype(dtype).itemsize
    sub = _SUBLANE.get(itemsize, 8)
    r, c = shape
    return _round_up(r, sub) * _round_up(c, 128) * itemsize


def _tpu_target_info():
    """Best-effort (vmem_capacity_bytes, tensorcores_per_chip, bf16_eup_ok)."""
    vmem_capacity = 128 << 20
    try:
        info = pltpu.get_tpu_info()
        vmem_capacity = int(getattr(info, "vmem_capacity_bytes", vmem_capacity))
    except Exception:
        pass
    kind = ""
    try:
        kind = jax.devices()[0].device_kind.lower()
    except Exception:
        pass
    is_v5e = any(t in kind for t in ("v5 lite", "v5e", "v5litepod"))
    is_v7 = ("v7" in kind) or ("tpu7" in kind) or ("tpu 7" in kind)
    cores = 2 if is_v7 else 1
    return vmem_capacity, cores, (not is_v5e)


def actor_critic_kernel(
    state_ref,            # [TB, S]    f32 (cast to bf16 in-kernel, hidden under DMA)
    w1_ref, b1_ref,       # [S, Hp]   bf16, [1, Hp] f32
    w2_ref, b2_ref,       # [Hp, Hp]  bf16, [1, Hp] f32
    wh_ref, bh_ref,       # [Hp, OUTP] bf16 fused actor|critic (lane padded), [1, OUTP] f32
    out_ref,              # [TB, OUTP] bf16: lanes [0,A) = probs, lane A = value, rest 0
    *,
    action_dim: int,
    bf16_elementwise: bool,
):
    x = state_ref[...].astype(w1_ref.dtype)   # in-kernel f32 -> bf16 cast (VPU, hidden)

    def dense_tanh(h, w_ref, b_ref):
        acc = jnp.dot(h, w_ref[...], preferred_element_type=jnp.float32) + b_ref[...]
        if bf16_elementwise:
            # v6e/v7x: bf16 EUP tanh (~2x transcendental throughput), feeds MXU directly
            return jnp.tanh(acc.astype(jnp.bfloat16))
        # v5e: no bf16 EUP -> compute tanh in f32, cast for the next matmul
        return jnp.tanh(acc).astype(jnp.bfloat16)

    h = dense_tanh(x, w1_ref, b1_ref)          # shared layer 1
    h = dense_tanh(h, w2_ref, b2_ref)          # shared layer 2

    # fused actor + critic head: one MXU push produces logits and value together
    head = jnp.dot(h, wh_ref[...], preferred_element_type=jnp.float32) + bh_ref[...]

    # numerically stable softmax over the actor lanes only (all in f32)
    col = jax.lax.broadcasted_iota(jnp.int32, head.shape, 1)
    is_actor = col < action_dim
    logits = jnp.where(is_actor, head, jnp.float32(-1e30))
    m = jnp.max(logits, axis=-1, keepdims=True)
    e = jnp.exp(logits - m)                    # padding lanes underflow to 0
    denom = jnp.sum(e, axis=-1, keepdims=True)
    probs = e / denom                          # exact normalization (sum == 1 in f32)

    # lane-dense combined output tile: probs | value | zeros, stored in bf16
    fused = jnp.where(is_actor, probs, jnp.where(col == action_dim, head, 0.0))
    out_ref[...] = fused.astype(out_ref.dtype)


def actor_critic_forward(state, params, *, batch_tile=4096,
                         compute_dtype=jnp.bfloat16, out_dtype=jnp.bfloat16):
    """state: [B, state_dim] f32. params: dict of [in, out] weights, [1, out] biases."""
    B, S = state.shape
    H = params["w1"].shape[1]
    A = params["wa"].shape[1]
    Hp = _round_up(H, 128)                    # lane-pad hidden width
    OUTP = _round_up(A + 1, 128)              # lane-dense fused output width

    vmem_capacity, num_cores, bf16_eup = _tpu_target_info()
    state_dtype = state.dtype
    st_isz = jnp.dtype(state_dtype).itemsize
    out_isz = jnp.dtype(out_dtype).itemsize

    # ---- VMEM-resident parameter footprint ((sublane,128)-padded) -----------
    param_bytes = (
        _padded_block_bytes((S, Hp), compute_dtype)
        + _padded_block_bytes((Hp, Hp), compute_dtype)
        + _padded_block_bytes((Hp, OUTP), compute_dtype)
        + 2 * _padded_block_bytes((1, Hp), jnp.float32)
        + _padded_block_bytes((1, OUTP), jnp.float32)
    )

    # ---- choose batch tile TB ------------------------------------------------
    state_row = _round_up(S, 128) * st_isz                 # lane-padded input row
    out_row = _round_up(OUTP, 128) * out_isz               # lane-padded output row
    tmp_row = 4 * _round_up(max(Hp, OUTP), 128) * 4        # ~4 live f32 temporaries/row
    per_row_bytes = 2 * state_row + 2 * out_row + tmp_row  # double-buffered I/O + temps

    budget = int(vmem_capacity * 0.6)                      # headroom for compiler scratch
    avail = budget - 2 * param_bytes - (2 << 20)
    tb_cap = max(_round_down(max(avail, 0) // per_row_bytes, 256), 256)

    tb = max(_round_down(min(batch_tile, tb_cap), 256), 256)   # multiple of 256 (and 16)
    B16 = _round_up(B, 16)
    if B16 <= tb:
        if num_cores >= 2 and B16 >= 32:
            tb = _round_up(_cdiv(B16, 2), 16)   # >=2 tiles so both v7x TCs get work
        else:
            tb = B16
    Bp = _round_up(B, tb)
    grid = (Bp // tb,)

    # ---- input prep: keep state f32, pad only if needed ----------------------
    if Bp != B:
        state = jnp.pad(state, ((0, Bp - B), (0, 0)))

    f32 = jnp.float32
    w1 = jnp.zeros((S, Hp), compute_dtype).at[:, :H].set(params["w1"].astype(compute_dtype))
    b1 = jnp.zeros((1, Hp), f32).at[:, :H].set(params["b1"].astype(f32))
    w2 = jnp.zeros((Hp, Hp), compute_dtype).at[:H, :H].set(params["w2"].astype(compute_dtype))
    b2 = jnp.zeros((1, Hp), f32).at[:, :H].set(params["b2"].astype(f32))
    wh = jnp.zeros((Hp, OUTP), compute_dtype)
    wh = wh.at[:H, :A].set(params["wa"].astype(compute_dtype))
    wh = wh.at[:H, A].set(params["wc"][:, 0].astype(compute_dtype))
    bh = jnp.zeros((1, OUTP), f32)
    bh = bh.at[:, :A].set(params["ba"].astype(f32))
    bh = bh.at[:, A].set(params["bc"][:, 0].astype(f32))

    vmem_bytes = int(
        2 * _padded_block_bytes((tb, S), state_dtype)    # double-buffered state blocks
        + 2 * _padded_block_bytes((tb, OUTP), out_dtype) # double-buffered output blocks
        + 2 * param_bytes                                # grid-resident weights (conservative)
        + tb * tmp_row                                   # in-kernel temporaries
        + (4 << 20))                                     # headroom / internal scratch
    vmem_bytes = min(max(vmem_bytes, 16 << 20), int(vmem_capacity * 0.9))

    cost = pl.CostEstimate(
        flops=2 * Bp * (S * Hp + Hp * Hp + Hp * OUTP),
        transcendentals=Bp * (2 * Hp + OUTP),
        bytes_accessed=int(Bp * S * st_isz + Bp * OUTP * out_isz + param_bytes),
    )

    def full_spec(shape):
        return pl.BlockSpec(shape, lambda i: (0,) * len(shape))

    use_bf16_ew = bool(bf16_eup and jnp.dtype(compute_dtype) == jnp.dtype(jnp.bfloat16))

    out = pl.pallas_call(
        functools.partial(actor_critic_kernel, action_dim=A,
                          bf16_elementwise=use_bf16_ew),
        out_shape=jax.ShapeDtypeStruct((Bp, OUTP), out_dtype),
        grid=grid,
        in_specs=[
            pl.BlockSpec((tb, S), lambda i: (i, 0)),     # streamed batch tiles (f32)
            full_spec(w1.shape), full_spec(b1.shape),    # weights stay VMEM-resident
            full_spec(w2.shape), full_spec(b2.shape),
            full_spec(wh.shape), full_spec(bh.shape),
        ],
        out_specs=pl.BlockSpec((tb, OUTP), lambda i: (i, 0)),
        compiler_params=pltpu.CompilerParams(
            dimension_semantics=("parallel",),
            vmem_limit_bytes=vmem_bytes,
        ),
        cost_estimate=cost,
    )(state, w1, b1, w2, b2, wh, bh)

    probs = out[:B, :A].astype(jnp.float32)
    value = out[:B, A:A + 1].astype(jnp.float32)
    return probs, value


def init_params(key, state_dim, action_dim, hidden_dim):
    """Mirror the PyTorch module init: orthogonal(gain=sqrt(2)) weights, zero bias.
    Weights are stored pre-transposed as [in, out] for y = x @ W + b."""
    ortho = jax.nn.initializers.orthogonal(scale=math.sqrt(2.0))
    k1, k2, k3, k4 = jax.random.split(key, 4)
    w1 = ortho(k1, (hidden_dim, state_dim), jnp.float32).T
    w2 = ortho(k2, (hidden_dim, hidden_dim), jnp.float32).T
    wa = ortho(k3, (action_dim, hidden_dim), jnp.float32).T
    wc = ortho(k4, (1, hidden_dim), jnp.float32).T
    return {
        "w1": w1, "b1": jnp.zeros((1, hidden_dim), jnp.float32),
        "w2": w2, "b2": jnp.zeros((1, hidden_dim), jnp.float32),
        "wa": wa, "ba": jnp.zeros((1, action_dim), jnp.float32),
        "wc": wc, "bc": jnp.zeros((1, 1), jnp.float32),
    }


def reference_forward(state, params, compute_dtype=jnp.bfloat16):
    """Pure-JAX reference with the same bf16-operand / f32-accumulate matmul semantics."""
    def mm(x, w):
        return jnp.dot(x.astype(compute_dtype), w.astype(compute_dtype),
                       preferred_element_type=jnp.float32)
    h = jnp.tanh(mm(state, params["w1"]) + params["b1"])
    h = jnp.tanh(mm(h, params["w2"]) + params["b2"])
    logits = mm(h, params["wa"]) + params["ba"]
    value = mm(h, params["wc"]) + params["bc"]
    probs = jax.nn.softmax(logits, axis=-1)
    return probs, value


# TODO(synk): only the default config (num_layers=2, activation='tanh') is implemented;
# other depths/activations and get_action's Categorical sampling live outside this kernel.

if __name__ == "__main__":
    # Small shapes consistent with the module's forward:
    #   state [batch, state_dim] -> probs [batch, action_dim], value [batch, 1]
    batch, state_dim, action_dim, hidden_dim = 4, 8, 4, 64

    key = jax.random.PRNGKey(0)
    k_state, k_params = jax.random.split(key)
    state = jax.random.normal(k_state, (batch, state_dim), dtype=jnp.float32)
    params = init_params(k_params, state_dim, action_dim, hidden_dim)

    probs, value = actor_critic_forward(state, params)
    jax.block_until_ready((probs, value))

    ref_probs, ref_value = reference_forward(state, params)
    assert probs.shape == (batch, action_dim)
    assert value.shape == (batch, 1)
    # bf16 MXU operands + bf16 tanh (v6e/v7x) + bf16 output store -> loose tolerances
    assert jnp.allclose(probs, ref_probs, atol=2e-2, rtol=2e-2)
    assert jnp.allclose(value, ref_value, atol=2e-2, rtol=2e-2)
    assert jnp.allclose(jnp.sum(probs, axis=-1), 1.0, atol=1e-2)

    print("KERNEL_OK")
</pallas_src>

<mosaic_0001>
module attributes {stable_mosaic.version = 11 : i64} {
  func.func @actor_critic_kernel(%arg0: i32, %arg1: memref<16x8xf32, #tpu.memory_space<vmem>>, %arg2: memref<8x128xbf16, #tpu.memory_space<vmem>>, %arg3: memref<1x128xf32, #tpu.memory_space<vmem>>, %arg4: memref<128x128xbf16, #tpu.memory_space<vmem>>, %arg5: memref<1x128xf32, #tpu.memory_space<vmem>>, %arg6: memref<128x128xbf16, #tpu.memory_space<vmem>>, %arg7: memref<1x128xf32, #tpu.memory_space<vmem>>, %arg8: memref<16x128xbf16, #tpu.memory_space<vmem>>) attributes {dimension_semantics = [#tpu.dimension_semantics<parallel>], iteration_bounds = array<i64: 1>, scalar_prefetch = 0 : i64, scratch_operands = 0 : i64, tpu.core_type = #tpu.core_type<tc>, window_params = [{transform_indices = @transform_0, window_bounds = array<i64: 16, 8>}, {pipeline_mode = #tpu.pipeline_mode<synchronous>, transform_indices = @transform_1, window_bounds = array<i64: 8, 128>}, {pipeline_mode = #tpu.pipeline_mode<synchronous>, transform_indices = @transform_2, window_bounds = array<i64: 1, 128>}, {pipeline_mode = #tpu.pipeline_mode<synchronous>, transform_indices = @transform_3, window_bounds = array<i64: 128, 128>}, {pipeline_mode = #tpu.pipeline_mode<synchronous>, transform_indices = @transform_4, window_bounds = array<i64: 1, 128>}, {pipeline_mode = #tpu.pipeline_mode<synchronous>, transform_indices = @transform_5, window_bounds = array<i64: 128, 128>}, {pipeline_mode = #tpu.pipeline_mode<synchronous>, transform_indices = @transform_6, window_bounds = array<i64: 1, 128>}, {transform_indices = @transform_7, window_bounds = array<i64: 16, 128>}]} {
    %c0 = arith.constant 0 : index
    %c0_0 = arith.constant 0 : index
    %0 = vector.load %arg1[%c0, %c0_0] : memref<16x8xf32, #tpu.memory_space<vmem>>, vector<16x8xf32>
    %1 = arith.truncf %0 : vector<16x8xf32> to vector<16x8xbf16>
    %c0_1 = arith.constant 0 : index
    %c0_2 = arith.constant 0 : index
    %2 = vector.load %arg2[%c0_1, %c0_2] : memref<8x128xbf16, #tpu.memory_space<vmem>>, vector<8x128xbf16>
    %cst = arith.constant dense<0.000000e+00> : vector<16x128xf32>
    %3 = tpu.matmul %1, %2, %cst {dimension_numbers = #tpu.dot_dimension_numbers<[1], [0], [0], [1], [0, 0, 1, 1], [], []>} : vector<16x8xbf16>, vector<8x128xbf16>, vector<16x128xf32> -> vector<16x128xf32>
    %c0_3 = arith.constant 0 : index
    %c0_4 = arith.constant 0 : index
    %4 = vector.load %arg3[%c0_3, %c0_4] : memref<1x128xf32, #tpu.memory_space<vmem>>, vector<1x128xf32>
    %5 = vector.broadcast %4 : vector<1x128xf32> to vector<16x128xf32>
    %6 = arith.addf %3, %5 : vector<16x128xf32>
    %7 = arith.truncf %6 : vector<16x128xf32> to vector<16x128xbf16>
    %8 = math.tanh %7 : vector<16x128xbf16>
    %c0_5 = arith.constant 0 : index
    %c0_6 = arith.constant 0 : index
    %9 = vector.load %arg4[%c0_5, %c0_6] : memref<128x128xbf16, #tpu.memory_space<vmem>>, vector<128x128xbf16>
    %cst_7 = arith.constant dense<0.000000e+00> : vector<16x128xf32>
    %10 = tpu.matmul %8, %9, %cst_7 {dimension_numbers = #tpu.dot_dimension_numbers<[1], [0], [0], [1], [0, 0, 1, 1], [], []>} : vector<16x128xbf16>, vector<128x128xbf16>, vector<16x128xf32> -> vector<16x128xf32>
    %c0_8 = arith.constant 0 : index
    %c0_9 = arith.constant 0 : index
    %11 = vector.load %arg5[%c0_8, %c0_9] : memref<1x128xf32, #tpu.memory_space<vmem>>, vector<1x128xf32>
    %12 = vector.broadcast %11 : vector<1x128xf32> to vector<16x128xf32>
    %13 = arith.addf %10, %12 : vector<16x128xf32>
    %14 = arith.truncf %13 : vector<16x128xf32> to vector<16x128xbf16>
    %15 = math.tanh %14 : vector<16x128xbf16>
    %c0_10 = arith.constant 0 : index
    %c0_11 = arith.constant 0 : index
    %16 = vector.load %arg6[%c0_10, %c0_11] : memref<128x128xbf16, #tpu.memory_space<vmem>>, vector<128x128xbf16>
    %cst_12 = arith.constant dense<0.000000e+00> : vector<16x128xf32>
    %17 = tpu.matmul %15, %16, %cst_12 {dimension_numbers = #tpu.dot_dimension_numbers<[1], [0], [0], [1], [0, 0, 1, 1], [], []>} : vector<16x128xbf16>, vector<128x128xbf16>, vector<16x128xf32> -> vector<16x128xf32>
    %c0_13 = arith.constant 0 : index
    %c0_14 = arith.constant 0 : index
    %18 = vector.load %arg7[%c0_13, %c0_14] : memref<1x128xf32, #tpu.memory_space<vmem>>, vector<1x128xf32>
    %19 = vector.broadcast %18 : vector<1x128xf32> to vector<16x128xf32>
    %20 = arith.addf %17, %19 : vector<16x128xf32>
    %21 = tpu.iota {dimensions = array<i32: 1>} : vector<16x128xi32>
    %c4_i32 = arith.constant 4 : i32
    %22 = vector.broadcast %c4_i32 : i32 to vector<16x128xi32>
    %23 = arith.cmpi slt, %21, %22 : vector<16x128xi32>
    %cst_15 = arith.constant -1.000000e+30 : f32
    %24 = vector.broadcast %cst_15 : f32 to vector<16x128xf32>
    %25 = arith.select %23, %20, %24 : vector<16x128xi1>, vector<16x128xf32>
    %cst_16 = arith.constant dense<0xFF800000> : vector<16xf32>
    %26 = vector.multi_reduction <maximumf>, %25, %cst_16 [1] : vector<16x128xf32> to vector<16xf32>
    %27 = vector.shape_cast %26 : vector<16xf32> to vector<16x1xf32>
    %28 = vector.broadcast %27 : vector<16x1xf32> to vector<16x128xf32>
    %29 = arith.subf %25, %28 : vector<16x128xf32>
    %30 = math.exp %29 : vector<16x128xf32>
    %cst_17 = arith.constant dense<0.000000e+00> : vector<16xf32>
    %31 = vector.multi_reduction <add>, %30, %cst_17 [1] : vector<16x128xf32> to vector<16xf32>
    %32 = vector.shape_cast %31 : vector<16xf32> to vector<16x1xf32>
    %33 = vector.broadcast %32 : vector<16x1xf32> to vector<16x128xf32>
    %34 = arith.divf %30, %33 : vector<16x128xf32>
    %c4_i32_18 = arith.constant 4 : i32
    %35 = vector.broadcast %c4_i32_18 : i32 to vector<16x128xi32>
    %36 = arith.cmpi eq, %21, %35 : vector<16x128xi32>
    %cst_19 = arith.constant 0.000000e+00 : f32
    %37 = vector.broadcast %cst_19 : f32 to vector<16x128xf32>
    %38 = arith.select %36, %20, %37 : vector<16x128xi1>, vector<16x128xf32>
    %39 = arith.select %23, %34, %38 : vector<16x128xi1>, vector<16x128xf32>
    %40 = arith.truncf %39 : vector<16x128xf32> to vector<16x128xbf16>
    %c0_20 = arith.constant 0 : index
    %c0_21 = arith.constant 0 : index
    %41 = vector.load %arg8[%c0_20, %c0_21] : memref<16x128xbf16, #tpu.memory_space<vmem>>, vector<16x128xbf16>
    tpu.vector_store %arg8[%c0_20, %c0_21], %40 {strides = array<i32>} : memref<16x128xbf16, #tpu.memory_space<vmem>>, vector<16x128xbf16>,
    return
  }
  func.func @transform_0(%arg0: i32) -> (i32, i32) {
    %c0_i32 = arith.constant 0 : i32
    %c0_i32_0 = arith.constant 0 : i32
    return %arg0, %c0_i32 : i32, i32
  }
  func.func @transform_1(%arg0: i32) -> (i32, i32) {
    %c0_i32 = arith.constant 0 : i32
    %c0_i32_0 = arith.constant 0 : i32
    %c0_i32_1 = arith.constant 0 : i32
    return %c0_i32, %c0_i32_0 : i32, i32
  }
  func.func @transform_2(%arg0: i32) -> (i32, i32) {
    %c0_i32 = arith.constant 0 : i32
    %c0_i32_0 = arith.constant 0 : i32
    %c0_i32_1 = arith.constant 0 : i32
    return %c0_i32, %c0_i32_0 : i32, i32
  }
  func.func @transform_3(%arg0: i32) -> (i32, i32) {
    %c0_i32 = arith.constant 0 : i32
    %c0_i32_0 = arith.constant 0 : i32
    %c0_i32_1 = arith.constant 0 : i32
    return %c0_i32, %c0_i32_0 : i32, i32
  }
  func.func @transform_4(%arg0: i32) -> (i32, i32) {
    %c0_i32 = arith.constant 0 : i32
    %c0_i32_0 = arith.constant 0 : i32
    %c0_i32_1 = arith.constant 0 : i32
    return %c0_i32, %c0_i32_0 : i32, i32
  }
  func.func @transform_5(%arg0: i32) -> (i32, i32) {
    %c0_i32 = arith.constant 0 : i32
    %c0_i32_0 = arith.constant 0 : i32
    %c0_i32_1 = arith.constant 0 : i32
    return %c0_i32, %c0_i32_0 : i32, i32
  }
  func.func @transform_6(%arg0: i32) -> (i32, i32) {
    %c0_i32 = arith.constant 0 : i32
    %c0_i32_0 = arith.constant 0 : i32
    %c0_i32_1 = arith.constant 0 : i32
    return %c0_i32, %c0_i32_0 : i32, i32
  }
  func.func @transform_7(%arg0: i32) -> (i32, i32) {
    %c0_i32 = arith.constant 0 : i32
    %c0_i32_0 = arith.constant 0 : i32
    return %arg0, %c0_i32 : i32, i32
  }
}

</mosaic_0001>

<bundles_post_ra>
// kernel: tpu_custom_call.1
= control target key start
LH: loop header
LB: loop body
LE: loop exit
PB: predicated region body
PF: predicated region fallthrough
CT: control target
= control target key end

     0   :  { %12 = vsyncpa [#allocation3], 0  ;;  %s739_s0 = inlined_call_operand.vmem [shape: f32[16,8], index: 0, kind: input, shape index: {}]   ;;  %s740_s1 = inlined_call_operand.vmem [shape: bf16[8,128], index: 1, kind: input, shape index: {}]   ;;  %s741_s2 = inlined_call_operand.vmem [shape: f32[1,128], index: 2, kind: input, shape index: {}]   ;;  %s742_s3 = inlined_call_operand.hbm [shape: bf16[128,128], index: 3, kind: input, shape index: {}]   ;;  %s743_s4 = inlined_call_operand.vmem [shape: f32[1,128], index: 4, kind: input, shape index: {}]   ;;  %s744_s5 = inlined_call_operand.hbm [shape: bf16[128,128], index: 5, kind: input, shape index: {}]   ;;  %s745_s6 = inlined_call_operand.vmem [shape: f32[1,128], index: 6, kind: input, shape index: {}]   ;;  %s746_s7 = inlined_call_operand.hbm [shape: bf16[16,128], index: 7, kind: output, shape index: {}]  }
   0x1   :  { %13 = vsyncpa [#allocation6], 0 }
   0x2   :  { %14 = vsyncpa [#allocation4], 0  ;;  %s602_s24 = smov [#allocation2]   ;;  %s530_s28 = scalar_lea.hbm %s742_s3, 1024 }
   0x3   :  { %s26_s25 = sshll.u32 %s602_s24, 4  ;;  %p531_p0 = scmp.ne.s32.totalorder %s742_s3, %s530_s28  ;;  %s27_s25 = int_to_ptr.vmem [resolvable:$true] %s26_s25 }
   0x4   :  { %p534_p1 = scmp.lt.u32.totalorder %s530_s28, %s742_s3 }
   0x6   :  { %p536_p2 = pnand %p534_p1, %p531_p0 }
   0x8   :  { %539 = shalt.err (!%p536_p2)
}
   0x9   :  { %s540_s10 = scalar_lea.vmem %s27_s25, 1024  ;;  %p545_p4 = scmp.lt.s32.totalorder %s27_s25, %s27_s25 }
   0xa   :  { %p541_p3 = scmp.ne.s32.totalorder %s27_s25, %s540_s10  ;;  %p546_p5 = scmp.lt.s32.totalorder %s540_s10, %s540_s10 }
   0xc   :  { %p547_p6 = por %p546_p5, %p545_p4 }
   0xe   :  { %p548_p7 = pnand %p547_p6, %p541_p3 }
  0x10   :  { %551 = shalt.err (!%p548_p7)
}
  0x11   :  { %s603_s11 = smov 64   ;;  %s604_s12 = smov 4  }
  0x12   :  { %32 = dma.hbm_to_vmem [thread:$0]  %s742_s3, 1024, %s27_s25, [#allocation3], %s603_s11, %s603_s11, %s604_s12  }
  0x13   :  { %s605_s15 = smov [#allocation5]   ;;  %s552_s19 = scalar_lea.hbm %s744_s5, 1024 }
  0x14   :  { %s40_s16 = sshll.u32 %s605_s15, 4  ;;  %p553_p8 = scmp.ne.s32.totalorder %s744_s5, %s552_s19  ;;  %s41_s16 = int_to_ptr.vmem [resolvable:$true] %s40_s16 }
  0x15   :  { %p556_p9 = scmp.lt.u32.totalorder %s552_s19, %s744_s5 }
  0x17   :  { %p558_p10 = pnand %p556_p9, %p553_p8 }
  0x19   :  { %561 = shalt.err (!%p558_p10)
}
  0x1a   :  { %s562_s24 = scalar_lea.vmem %s41_s16, 1024  ;;  %p567_p12 = scmp.lt.s32.totalorder %s41_s16, %s41_s16 }
  0x1b   :  { %p563_p11 = scmp.ne.s32.totalorder %s41_s16, %s562_s24  ;;  %p568_p13 = scmp.lt.s32.totalorder %s562_s24, %s562_s24 }
  0x1d   :  { %p569_p0 = por %p568_p13, %p567_p12 }
  0x1f   :  { %p570_p1 = pnand %p569_p0, %p563_p11 }
  0x21   :  { %573 = shalt.err (!%p570_p1)
}
  0x22   :  { %46 = dma.hbm_to_vmem [thread:$0]  %s744_s5, 1024, %s41_s16, [#allocation6], %s603_s11, %s603_s11, %s604_s12  }
  0x23   :  { %596 = dma.done.wait [#allocation3], 1024  }
  0x24   :  { %597 = vsyncadd [#allocation3], 4294966272 }
  0x25   :  { %598 = dma.done.wait [#allocation6], 1024  }
  0x26   :  { %599 = vsyncadd [#allocation6], 4294966272  ;;  %v606_v0 = vmov 0.0   ;;  %vm607_vm0 = vmmov 0   ;;  %vm71_vm1 = vcmask 1043456   ;;  %v56_v2 = vld [vmem:[%s739_s0] sm:$0xff]  ;;  %v344_v40 = vlaneseq }
  0x27   :  { %449 = vmatprep.subr.bf16.mxu0 %v606_v0  ;;  %451 = vmatprep.mubr.msk.bf16.mxu0 %vm607_vm0, %v606_v0  ;;  %v59_v1 = vld [vmem:[%s740_s1] sm:$0xf]  ;;  %v57_v3 = vld [vmem:[%s739_s0 + $0x8] sm:$0xff]  ;;  %vm67_vm2 = vcmask 64512   ;;  %v504_v8 = vld [vmem:[#allocation2 + $0x10] sm:$0xff]  }
  0x28   :  { %455 = vmatprep.subr.bf16.mxu1 %v606_v0  ;;  %471 = vmatprep.mubr.msk.bf16.mxu1 %vm607_vm0, %v606_v0  ;;  %v73_v4 = vsel %vm71_vm1, %v59_v1, 0  ;;  %v58_v5 = vpack.c.bf16 %v57_v3, %v56_v2  ;;  %v502_v6 = vld [vmem:[#allocation2] sm:$0xff]   ;;  %v503_v7 = vld [vmem:[#allocation2 + $0x8] sm:$0xff]   ;;  %v505_v9 = vld [vmem:[#allocation2 + $0x18] sm:$0xff]   ;;  %v345_v41 = vand.u32 127, %v344_v40 }
  0x29   :  { %450 = vmatpush3.bf16.msra.mxu0 %v73_v4  ;;  %456 = vmatpush3.bf16.msra.mxu1 %v502_v6  ;;  %v506_v10 = vld [vmem:[#allocation2 + $0x20] sm:$0xff]   ;;  %v507_v11 = vld [vmem:[#allocation2 + $0x28] sm:$0xff]   ;;  %v508_v12 = vld [vmem:[#allocation2 + $0x30] sm:$0xff]  }
  0x2a   :  { %475 = vmatprep.subr.bf16.mxu0 %v606_v0  ;;  %457 = vmatprep.subr.bf16.mxu1 %v606_v0  ;;  %v509_v13 = vld [vmem:[#allocation2 + $0x38] sm:$0xff]   ;;  %v510_v14 = vld [vmem:[#allocation5] sm:$0xff]   ;;  %v511_v15 = vld [vmem:[#allocation5 + $0x8] sm:$0xff]   ;;  %vm367_vm3 = vcmp.eq.s32.totalorder %v345_v41, 4  ;;  %vm346_vm4 = vcmp.lt.s32.totalorder %v345_v41, 4 }
  0x2b   :  { %v512_v16 = vld [vmem:[#allocation5 + $0x10] sm:$0xff]   ;;  %v400_v17 = vld [vmem:[%s741_s2] ss:$0 sm:$0xff]  ;;  %v513_v26 = vld [vmem:[#allocation5 + $0x18] sm:$0xff]  }
  0x2c   :  { %452 = vmatmul.mubr.msk.bf16.vlgmr.msra.gmra.mrb[0].mxu0 %vm67_vm2, %v58_v5  ;;  %v514_v27 = vld [vmem:[#allocation5 + $0x20] sm:$0xff]   ;;  %v515_v28 = vld [vmem:[#allocation5 + $0x28] sm:$0xff]   ;;  %v516_v29 = vld [vmem:[#allocation5 + $0x30] sm:$0xff]  }
  0x2d   :  { %491 = vmatprep.mubr.msk.bf16.mxu0 %vm607_vm0, %v606_v0  ;;  %458 = vmatpush3.bf16.msra.mxu1 %v503_v7  ;;  %v517_v30 = vld [vmem:[#allocation5 + $0x38] sm:$0xff]   ;;  %v402_v31 = vld [vmem:[%s743_s4] ss:$0 sm:$0xff]  ;;  %s608_s4 = smov [#allocation7]  }
  0x2e   :  { %459 = vmatprep.subr.bf16.mxu1 %v606_v0  ;;  %476 = vmatpush3.bf16.msra.mxu0 %v510_v14  ;;  %v411_v42 = vld [vmem:[%s745_s6] ss:$0 sm:$0xff]  ;;  %s387_s6 = sshll.u32 %s608_s4, 4  ;;  %s388_s6 = int_to_ptr.vmem [resolvable:$true] %s387_s6 }
  0x2f   :  { %477 = vmatprep.subr.bf16.mxu0 %v606_v0  ;;  %s574_s13 = scalar_lea.vmem %s388_s6, 128  ;;  %p579_p3 = scmp.lt.s32.totalorder %s388_s6, %s388_s6 }
  0x30   :  { %p575_p2 = scmp.ne.s32.totalorder %s388_s6, %s574_s13  ;;  %p580_p4 = scmp.lt.s32.totalorder %s574_s13, %s574_s13 }
  0x31   :  { %460 = vmatpush3.bf16.msra.mxu1 %v504_v8 }
  0x32   :  { %461 = vmatprep.subr.bf16.mxu1 %v606_v0  ;;  %478 = vmatpush3.bf16.msra.mxu0 %v511_v15  ;;  %p581_p5 = por %p580_p4, %p579_p3 }
  0x33   :  { %479 = vmatprep.subr.bf16.mxu0 %v606_v0 }
  0x34   :  { %p582_p6 = pnand %p581_p5, %p575_p2 }
  0x35   :  { %462 = vmatpush3.bf16.msra.mxu1 %v505_v9 }
  0x36   :  { %463 = vmatprep.subr.bf16.mxu1 %v606_v0  ;;  %480 = vmatpush3.bf16.msra.mxu0 %v512_v16 }
  0x37   :  { %481 = vmatprep.subr.bf16.mxu0 %v606_v0 }
  0x39   :  { %464 = vmatpush3.bf16.msra.mxu1 %v506_v10 }
  0x3a   :  { %465 = vmatprep.subr.bf16.mxu1 %v606_v0  ;;  %482 = vmatpush3.bf16.msra.mxu0 %v513_v26 }
  0x3b   :  { %483 = vmatprep.subr.bf16.mxu0 %v606_v0 }
  0x3d   :  { %466 = vmatpush3.bf16.msra.mxu1 %v507_v11 }
  0x3e   :  { %467 = vmatprep.subr.bf16.mxu1 %v606_v0  ;;  %484 = vmatpush3.bf16.msra.mxu0 %v514_v27 }
  0x3f   :  { %485 = vmatprep.subr.bf16.mxu0 %v606_v0 }
  0x41   :  { %468 = vmatpush3.bf16.msra.mxu1 %v508_v12 }
  0x42   :  { %469 = vmatprep.subr.bf16.mxu1 %v606_v0  ;;  %486 = vmatpush3.bf16.msra.mxu0 %v515_v28 }
  0x43   :  { %487 = vmatprep.subr.bf16.mxu0 %v606_v0 }
  0x45   :  { %470 = vmatpush3.bf16.msra.mxu1 %v509_v13 }
  0x46   :  { %488 = vmatpush3.bf16.msra.mxu0 %v516_v29 }
  0x47   :  { %489 = vmatprep.subr.bf16.mxu0 %v606_v0 }
  0x4a   :  { %490 = vmatpush3.bf16.msra.mxu0 %v517_v30 }
  0xff   :  { %v109_v18 = vpop.f32.mrb[0].mxu0 }
 0x100   :  { %v453_v19 = vpop.f32.mrb[1].mxu0  ;;  %v110_v21 = vadd.f32 %v400_v17, %v109_v18 }
 0x101   :  { %v112_v20 = vpop.f32.mrb[2].mxu0 }
 0x102   :  { %v113_v22 = vadd.f32 %v400_v17, %v112_v20  ;;  %v454_v23 = vpop.f32.mrb[3].mxu0 }
 0x104   :  { %v116_v24 = vpack.c.bf16 %v113_v22, %v110_v21 }
 0x106   :  { %518 = vtanh.bf16 %v116_v24 }
 0x111   :  { %v519_v25 = vpop.eup %518 }
 0x112   :  { %472 = vmatmul.mubr.bf16.vlgmr.msra.gmra.mrb[0].mxu1 %v519_v25 }
 0x1e5   :  { %v223_v32 = vpop.f32.mrb[0].mxu1 }
 0x1e6   :  { %v473_v33 = vpop.f32.mrb[1].mxu1  ;;  %v224_v35 = vadd.f32 %v402_v31, %v223_v32 }
 0x1e7   :  { %v226_v34 = vpop.f32.mrb[2].mxu1 }
 0x1e8   :  { %v227_v36 = vadd.f32 %v402_v31, %v226_v34  ;;  %v474_v37 = vpop.f32.mrb[3].mxu1 }
 0x1ea   :  { %v230_v38 = vpack.c.bf16 %v227_v36, %v224_v35 }
 0x1ec   :  { %520 = vtanh.bf16 %v230_v38 }
 0x1f7   :  { %v521_v39 = vpop.eup %520 }
 0x1f8   :  { %492 = vmatmul.mubr.bf16.vlgmr.msra.gmra.mrb[4].mxu0 %v521_v39 }
 0x2cb   :  { %v337_v43 = vpop.f32.mrb[4].mxu0 }
 0x2cc   :  { %v338_v44 = vadd.f32 %v411_v42, %v337_v43  ;;  %v493_v45 = vpop.f32.mrb[5].mxu0 }
 0x2cd   :  { %v340_v46 = vpop.f32.mrb[6].mxu0 }
 0x2ce   :  { %v368_v47 = vsel %vm367_vm3, %v338_v44, 0.0  ;;  %v341_v48 = vadd.f32 %v411_v42, %v340_v46  ;;  %v494_v49 = vpop.f32.mrb[7].mxu0  ;;  %v347_v50 = vsel %vm346_vm4, %v338_v44, -1e+30 }
 0x2cf   :  { %349 = vmax.xlane.f32.xlu0 %v347_v50 }
 0x2d0   :  { %v369_v51 = vsel %vm367_vm3, %v341_v48, 0.0  ;;  %v348_v52 = vsel %vm346_vm4, %v341_v48, -1e+30 }
 0x2d3   :  { %351 = vmax.xlane.f32.xlu0 %v348_v52 }
 0x35c   :  { %v350_v53 = vpop.xlane.xlu0 %349 }
 0x35d   :  { %v353_v54 = vsub.f32 %v347_v50, %v350_v53 }
 0x35f   :  { %v355_v55 = vmul.f32 1.442695, %v353_v54 }
 0x360   :  { %v352_v56 = vpop.xlane.xlu0 %351 }
 0x361   :  { %522 = vpow2.f32 %v355_v55  ;;  %v354_v57 = vsub.f32 %v348_v52, %v352_v56 }
 0x363   :  { %v357_v58 = vmul.f32 1.442695, %v354_v57 }
 0x365   :  { %524 = vpow2.f32 %v357_v58 }
 0x36b   :  { %v523_v59 = vpop.eup %522 }
 0x36c   :  { %359 = vadd.xlane.f32.xlu1 %v523_v59 }
 0x36f   :  { %v525_v60 = vpop.eup %524 }
 0x370   :  { %361 = vadd.xlane.f32.xlu1 %v525_v60 }
 0x3f9   :  { %v360_v61 = vpop.xlane.xlu1 %359 }
 0x3fa   :  { %526 = vrcp.f32 %v360_v61 }
 0x3fd   :  { %v362_v62 = vpop.xlane.xlu1 %361 }
 0x3fe   :  { %528 = vrcp.f32 %v362_v62 }
 0x404   :  { %v527_v63 = vpop.eup %526 }
 0x405   :  { %v364_v0 = vmul.f32 %v527_v63, %v523_v59 }
 0x407   :  { %v370_v3 = vsel %vm346_vm4, %v364_v0, %v368_v47 }
 0x408   :  { %v529_v1 = vpop.eup %528 }
 0x409   :  { %v366_v2 = vmul.f32 %v529_v1, %v525_v60 }
 0x40b   :  { %v371_v4 = vsel %vm346_vm4, %v366_v2, %v369_v51 }
 0x40c   :  { %v427_v5 = vpack.c.bf16 %v371_v4, %v370_v3 }
 0x40e   :  { %428 = vst [vmem:[#allocation7] sm:$0xff] %v427_v5  }
 0x40f   :  { %585 = shalt.err (!%p582_p6)
}
 0x410   :  { %s586_s16 = scalar_lea.hbm %s746_s7, 128 }
 0x411   :  { %p587_p7 = scmp.ne.s32.totalorder %s746_s7, %s586_s16  ;;  %p590_p8 = scmp.lt.u32.totalorder %s586_s16, %s746_s7 }
 0x413   :  { %p592_p9 = pnand %p590_p8, %p587_p7 }
 0x415   :  { %595 = shalt.err (!%p592_p9)
}
 0x416   :  { %393 = dma.vmem_to_hbm [thread:$0]  %s388_s6, 128, %s746_s7, [#allocation4], %s603_s11, %s603_s11, %s604_s12  }
 0x417   :  { %600 = dma.done.wait [#allocation4], 128  }
 0x418   :  { %601 = vsyncadd [#allocation4], 4294967168 }
 0x419   :  { %397 = vsyncpa [#allocation3], 1 }
 0x41a   :  { %398 = vsyncpa [#allocation6], 1 }
 0x41b   :  { %399 = vsyncpa [#allocation4], 1 }

</bundles_post_ra>
